<compile_context>
chip_gen: v7x
topology: tpu7x:2x2x1
jax: 0.10.0
libtpu: 0.0.40
codegen_flags: <defaults>
</compile_context>

<pallas_src>
import functools

import jax
import jax.numpy as jnp
from jax.experimental import pallas as pl
from jax.experimental.pallas import tpu as pltpu


def _round_up(n, m):
    return ((n + m - 1) // m) * m


def _fused_heads_kernel(x_ref, w1_ref, b1_ref, w2_ref, b2_ref, out_ref):
    x = x_ref[...]                                     # [TILE_N, H]  (f32)
    # First layer (both heads fused on the lane axis): [TILE_N, H] @ [H, 2*Hh]
    h = jnp.dot(x, w1_ref[...], preferred_element_type=jnp.float32) + b1_ref[...]
    # LeakyReLU(0.2): mul + max (cheaper than cmp + mul + select)
    h = jnp.maximum(h, 0.2 * h)
    # Second layer, block-diagonal weights -> fused [TILE_N, 2] pre-activation
    o = jnp.dot(h, w2_ref[...], preferred_element_type=jnp.float32) + b2_ref[...]
    # Sigmoid (exp + reciprocal on the otherwise-idle EUP slot)
    out_ref[...] = jax.nn.sigmoid(o).astype(out_ref.dtype)
    # TODO(synk): for store-bound regimes on v5e, a lane-dense [2, TILE_N] output
    # slab (rows on the 128-lane axis) would avoid masked vst; output traffic here
    # is ~6% of the x read, so the fused [TILE_N, 2] writeback is kept for simplicity.


def hetero_demand_hotness_predictor(x, params, tile_n=512):
    """x: [N, H] float32. params: dict of per-head weights (see init_params)."""
    N, H = x.shape
    Hh = H // 2

    # --- pack the two heads into fused weights (plain JAX, outside the kernel) ---
    w1_cat = jnp.concatenate([params["w1_d"], params["w1_h"]], axis=1)   # [H, 2*Hh]
    b1_cat = jnp.concatenate([params["b1_d"], params["b1_h"]], axis=1)   # [1, 2*Hh]
    z = jnp.zeros((Hh, 1), jnp.float32)
    w2_blk = jnp.concatenate(
        [jnp.concatenate([params["w2_d"], z], axis=1),
         jnp.concatenate([z, params["w2_h"]], axis=1)], axis=0)          # [2*Hh, 2]
    b2_cat = jnp.concatenate([params["b2_d"], params["b2_h"]], axis=1)   # [1, 2]

    # --- choose a row tile (multiple of 8) and pad N to a tile multiple ---
    tn = min(_round_up(tile_n, 8), _round_up(N, 8))
    n_pad = _round_up(N, tn)
    if n_pad != N:
        x = jnp.pad(x, ((0, n_pad - N), (0, 0)))
    grid = (n_pad // tn,)

    two_hh = 2 * Hh
    weight_bytes = 4 * (H * two_hh + two_hh + two_hh * 2 + 2)
    cost = pl.CostEstimate(
        flops=2 * n_pad * H * two_hh + 2 * n_pad * two_hh * 2 + 4 * n_pad * two_hh,
        transcendentals=2 * n_pad,
        bytes_accessed=n_pad * H * 4 + n_pad * 2 * 4 + weight_bytes,
    )

    fused = pl.pallas_call(
        _fused_heads_kernel,
        out_shape=jax.ShapeDtypeStruct((n_pad, 2), jnp.float32),
        grid=grid,
        in_specs=[
            pl.BlockSpec((tn, H), lambda i: (i, 0)),         # x: streamed per tile
            pl.BlockSpec((H, two_hh), lambda i: (0, 0)),     # W1_cat: resident
            pl.BlockSpec((1, two_hh), lambda i: (0, 0)),     # b1_cat: resident
            pl.BlockSpec((two_hh, 2), lambda i: (0, 0)),     # W2_blk: resident
            pl.BlockSpec((1, 2), lambda i: (0, 0)),          # b2_cat: resident
        ],
        out_specs=pl.BlockSpec((tn, 2), lambda i: (i, 0)),
        compiler_params=pltpu.CompilerParams(
            dimension_semantics=("parallel",)),
        cost_estimate=cost,
    )(x, w1_cat, b1_cat, w2_blk, b2_cat)

    fused = fused[:N]
    return fused[:, 0:1], fused[:, 1:2]


def init_params(key, hidden_dim):
    """Deterministic synthetic parameter init (matches PyTorch Linear shapes,
    stored pre-transposed as [in, out])."""
    Hh = hidden_dim // 2
    ks = jax.random.split(key, 8)
    scale1 = 1.0 / jnp.sqrt(hidden_dim)
    scale2 = 1.0 / jnp.sqrt(Hh)
    return {
        # demand head
        "w1_d": jax.random.uniform(ks[0], (hidden_dim, Hh), jnp.float32, -scale1, scale1),
        "b1_d": jax.random.uniform(ks[1], (1, Hh), jnp.float32, -scale1, scale1),
        "w2_d": jax.random.uniform(ks[2], (Hh, 1), jnp.float32, -scale2, scale2),
        "b2_d": jax.random.uniform(ks[3], (1, 1), jnp.float32, -scale2, scale2),
        # hotness head
        "w1_h": jax.random.uniform(ks[4], (hidden_dim, Hh), jnp.float32, -scale1, scale1),
        "b1_h": jax.random.uniform(ks[5], (1, Hh), jnp.float32, -scale1, scale1),
        "w2_h": jax.random.uniform(ks[6], (Hh, 1), jnp.float32, -scale2, scale2),
        "b2_h": jax.random.uniform(ks[7], (1, 1), jnp.float32, -scale2, scale2),
    }


def _reference(x, p):
    def head(w1, b1, w2, b2):
        h = x @ w1 + b1
        h = jnp.where(h > 0, h, 0.2 * h)
        return jax.nn.sigmoid(h @ w2 + b2)
    return (head(p["w1_d"], p["b1_d"], p["w2_d"], p["b2_d"]),
            head(p["w1_h"], p["b1_h"], p["w2_h"], p["b2_h"]))


if __name__ == "__main__":
    hidden_dim = 32
    num_nodes = 8

    key = jax.random.PRNGKey(0)
    kx, kp = jax.random.split(key)
    x = jax.random.normal(kx, (num_nodes, hidden_dim), jnp.float32)
    params = init_params(kp, hidden_dim)

    demand, hotness = hetero_demand_hotness_predictor(x, params)
    demand = jax.block_until_ready(demand)
    hotness = jax.block_until_ready(hotness)

    d_ref, h_ref = _reference(x, params)
    assert demand.shape == (num_nodes, 1) and hotness.shape == (num_nodes, 1)
    assert jnp.allclose(demand, d_ref, atol=1e-5), "demand mismatch"
    assert jnp.allclose(hotness, h_ref, atol=1e-5), "hotness mismatch"

    print("KERNEL_OK")
</pallas_src>

<mosaic_0001>
module attributes {stable_mosaic.version = 11 : i64} {
  func.func @_fused_heads_kernel(%arg0: i32, %arg1: memref<8x32xf32, #tpu.memory_space<vmem>>, %arg2: memref<32x32xf32, #tpu.memory_space<vmem>>, %arg3: memref<1x32xf32, #tpu.memory_space<vmem>>, %arg4: memref<32x2xf32, #tpu.memory_space<vmem>>, %arg5: memref<1x2xf32, #tpu.memory_space<vmem>>, %arg6: memref<8x2xf32, #tpu.memory_space<vmem>>) attributes {dimension_semantics = [#tpu.dimension_semantics<parallel>], iteration_bounds = array<i64: 1>, scalar_prefetch = 0 : i64, scratch_operands = 0 : i64, tpu.core_type = #tpu.core_type<tc>, window_params = [{transform_indices = @transform_0, window_bounds = array<i64: 8, 32>}, {pipeline_mode = #tpu.pipeline_mode<synchronous>, transform_indices = @transform_1, window_bounds = array<i64: 32, 32>}, {pipeline_mode = #tpu.pipeline_mode<synchronous>, transform_indices = @transform_2, window_bounds = array<i64: 1, 32>}, {pipeline_mode = #tpu.pipeline_mode<synchronous>, transform_indices = @transform_3, window_bounds = array<i64: 32, 2>}, {pipeline_mode = #tpu.pipeline_mode<synchronous>, transform_indices = @transform_4, window_bounds = array<i64: 1, 2>}, {transform_indices = @transform_5, window_bounds = array<i64: 8, 2>}]} {
    %c0 = arith.constant 0 : index
    %c0_0 = arith.constant 0 : index
    %0 = vector.load %arg1[%c0, %c0_0] : memref<8x32xf32, #tpu.memory_space<vmem>>, vector<8x32xf32>
    %c0_1 = arith.constant 0 : index
    %c0_2 = arith.constant 0 : index
    %1 = vector.load %arg2[%c0_1, %c0_2] : memref<32x32xf32, #tpu.memory_space<vmem>>, vector<32x32xf32>
    %cst = arith.constant dense<0.000000e+00> : vector<8x32xf32>
    %2 = tpu.matmul %0, %1, %cst {dimension_numbers = #tpu.dot_dimension_numbers<[1], [0], [0], [1], [0, 0, 1, 1], [], []>} : vector<8x32xf32>, vector<32x32xf32>, vector<8x32xf32> -> vector<8x32xf32>
    %c0_3 = arith.constant 0 : index
    %c0_4 = arith.constant 0 : index
    %3 = vector.load %arg3[%c0_3, %c0_4] : memref<1x32xf32, #tpu.memory_space<vmem>>, vector<1x32xf32>
    %4 = vector.broadcast %3 : vector<1x32xf32> to vector<8x32xf32>
    %5 = arith.addf %2, %4 : vector<8x32xf32>
    %cst_5 = arith.constant 2.000000e-01 : f32
    %6 = vector.broadcast %cst_5 : f32 to vector<8x32xf32>
    %7 = arith.mulf %6, %5 : vector<8x32xf32>
    %8 = arith.maximumf %5, %7 : vector<8x32xf32>
    %c0_6 = arith.constant 0 : index
    %c0_7 = arith.constant 0 : index
    %9 = vector.load %arg4[%c0_6, %c0_7] : memref<32x2xf32, #tpu.memory_space<vmem>>, vector<32x2xf32>
    %cst_8 = arith.constant dense<0.000000e+00> : vector<8x2xf32>
    %10 = tpu.matmul %8, %9, %cst_8 {dimension_numbers = #tpu.dot_dimension_numbers<[1], [0], [0], [1], [0, 0, 1, 1], [], []>} : vector<8x32xf32>, vector<32x2xf32>, vector<8x2xf32> -> vector<8x2xf32>
    %c0_9 = arith.constant 0 : index
    %c0_10 = arith.constant 0 : index
    %11 = vector.load %arg5[%c0_9, %c0_10] : memref<1x2xf32, #tpu.memory_space<vmem>>, vector<1x2xf32>
    %12 = vector.broadcast %11 : vector<1x2xf32> to vector<8x2xf32>
    %13 = arith.addf %10, %12 : vector<8x2xf32>
    %14 = arith.negf %13 : vector<8x2xf32>
    %15 = math.exp %14 : vector<8x2xf32>
    %cst_11 = arith.constant 1.000000e+00 : f32
    %16 = vector.broadcast %cst_11 : f32 to vector<8x2xf32>
    %17 = arith.addf %16, %15 : vector<8x2xf32>
    %18 = arith.divf %16, %17 : vector<8x2xf32>
    %c0_12 = arith.constant 0 : index
    %c0_13 = arith.constant 0 : index
    %19 = vector.load %arg6[%c0_12, %c0_13] : memref<8x2xf32, #tpu.memory_space<vmem>>, vector<8x2xf32>
    tpu.vector_store %arg6[%c0_12, %c0_13], %18 {strides = array<i32>} : memref<8x2xf32, #tpu.memory_space<vmem>>, vector<8x2xf32>,
    return
  }
  func.func @transform_0(%arg0: i32) -> (i32, i32) {
    %c0_i32 = arith.constant 0 : i32
    %c0_i32_0 = arith.constant 0 : i32
    return %arg0, %c0_i32 : i32, i32
  }
  func.func @transform_1(%arg0: i32) -> (i32, i32) {
    %c0_i32 = arith.constant 0 : i32
    %c0_i32_0 = arith.constant 0 : i32
    %c0_i32_1 = arith.constant 0 : i32
    return %c0_i32, %c0_i32_0 : i32, i32
  }
  func.func @transform_2(%arg0: i32) -> (i32, i32) {
    %c0_i32 = arith.constant 0 : i32
    %c0_i32_0 = arith.constant 0 : i32
    %c0_i32_1 = arith.constant 0 : i32
    return %c0_i32, %c0_i32_0 : i32, i32
  }
  func.func @transform_3(%arg0: i32) -> (i32, i32) {
    %c0_i32 = arith.constant 0 : i32
    %c0_i32_0 = arith.constant 0 : i32
    %c0_i32_1 = arith.constant 0 : i32
    return %c0_i32, %c0_i32_0 : i32, i32
  }
  func.func @transform_4(%arg0: i32) -> (i32, i32) {
    %c0_i32 = arith.constant 0 : i32
    %c0_i32_0 = arith.constant 0 : i32
    %c0_i32_1 = arith.constant 0 : i32
    return %c0_i32, %c0_i32_0 : i32, i32
  }
  func.func @transform_5(%arg0: i32) -> (i32, i32) {
    %c0_i32 = arith.constant 0 : i32
    %c0_i32_0 = arith.constant 0 : i32
    return %arg0, %c0_i32 : i32, i32
  }
}

</mosaic_0001>

<bundles_post_ra>
// kernel: tpu_custom_call.1
= control target key start
LH: loop header
LB: loop body
LE: loop exit
PB: predicated region body
PF: predicated region fallthrough
CT: control target
= control target key end

     0   :  { %10 = vsyncpa [#allocation3], 0  ;;  %s298_s18 = smov [#allocation2]   ;;  %s379_s0 = inlined_call_operand.hbm [shape: f32[8,32], index: 0, kind: input, shape index: {}]   ;;  %s380_s1 = inlined_call_operand.vmem [shape: f32[32,32], index: 1, kind: input, shape index: {}]   ;;  %s381_s2 = inlined_call_operand.vmem [shape: f32[1,32], index: 2, kind: input, shape index: {}]   ;;  %s382_s3 = inlined_call_operand.vmem [shape: f32[32,2], index: 3, kind: input, shape index: {}]   ;;  %s383_s4 = inlined_call_operand.vmem [shape: f32[1,2], index: 4, kind: input, shape index: {}]   ;;  %s384_s5 = inlined_call_operand.vmem [shape: f32[8,2], index: 5, kind: output, shape index: {}]  }
   0x1   :  { %s17_s19 = sshll.u32 %s298_s18, 4  ;;  %s274_s22 = scalar_lea.hbm %s379_s0, 128  ;;  %s18_s19 = int_to_ptr.vmem [resolvable:$true] %s17_s19 }
   0x2   :  { %p275_p0 = scmp.ne.s32.totalorder %s379_s0, %s274_s22  ;;  %p278_p1 = scmp.lt.u32.totalorder %s274_s22, %s379_s0 }
   0x4   :  { %p280_p2 = pnand %p278_p1, %p275_p0 }
   0x6   :  { %283 = shalt.err (!%p280_p2)
}
   0x7   :  { %s284_s27 = scalar_lea.vmem %s18_s19, 128  ;;  %p289_p4 = scmp.lt.s32.totalorder %s18_s19, %s18_s19 }
   0x8   :  { %p285_p3 = scmp.ne.s32.totalorder %s18_s19, %s284_s27  ;;  %p290_p5 = scmp.lt.s32.totalorder %s284_s27, %s284_s27 }
   0xa   :  { %p291_p6 = por %p290_p5, %p289_p4 }
   0xc   :  { %p292_p7 = pnand %p291_p6, %p285_p3 }
   0xe   :  { %295 = shalt.err (!%p292_p7)
}
   0xf   :  { %20 = dma.hbm_to_vmem [thread:$0]  %s379_s0, 128, %s18_s19, [#allocation3]  }
  0x10   :  { %296 = dma.done.wait [#allocation3], 128  }
  0x11   :  { %297 = vsyncadd [#allocation3], 4294967168  ;;  %v299_v0 = vmov 0.0|0.0   ;;  %vm300_vm0 = vmmov 0   ;;  %v301_v1 = vmov 0.0   ;;  %v33_v2 = vld [vmem:[%s380_s1] sm:$0xff] }
  0x12   :  { %254 = vmatprep.subr.bf16.mxu0 %v299_v0  ;;  %240 = vmatprep.mubr.msk.f32.mxu0 %vm300_vm0, %v301_v1  ;;  %v34_v3 = vld [vmem:[%s380_s1 + $0x8] sm:$0xff]  ;;  %v35_v4 = vld [vmem:[%s380_s1 + $0x10] sm:$0xff]  ;;  %v36_v6 = vld [vmem:[%s380_s1 + $0x18] sm:$0xff]  ;;  %vm44_vm1 = vcmask 261120   ;;  %vm210_vm2 = vcmask 15360  }
  0x13   :  { %260 = vmatprep.subr.bf16.mxu1 %v299_v0  ;;  %251 = vmatprep.mubr.msk.f32.mxu1 %vm300_vm0, %v301_v1  ;;  %v255_v5 = vpack.c.bf16 %v34_v3, %v33_v2  ;;  %v258_v7 = vpack.c.bf16 %v36_v6, %v35_v4  ;;  %v32_v8 = vld [vmem:[#allocation2] sm:$0xff]  ;;  %v121_v10 = vld [vmem:[%s382_s3 + $0x8] sm:$0xff]  ;;  %v122_v12 = vld [vmem:[%s382_s3 + $0x10] sm:$0xff] }
  0x14   :  { %v120_v9 = vld [vmem:[%s382_s3] sm:$0xff]  ;;  %v123_v13 = vld [vmem:[%s382_s3 + $0x18] sm:$0xff] }
  0x15   :  { %256 = vmatpush3.bf16.msra.mxu0 %v255_v5  ;;  %v261_v11 = vpack.c.bf16 %v121_v10, %v120_v9  ;;  %v264_v14 = vpack.c.bf16 %v123_v13, %v122_v12  ;;  %v217_v15 = vld [vmem:[%s381_s2] ss:$0 sm:$0xff] }
  0x16   :  { %257 = vmatprep.subr.bf16.mxu0 %v299_v0  ;;  %v219_v21 = vld [vmem:[%s383_s4] ss:$0 sm:$0xff] }
  0x17   :  { %262 = vmatpush3.bf16.msra.mxu1 %v261_v11 }
  0x18   :  { %263 = vmatprep.subr.bf16.mxu1 %v299_v0 }
  0x19   :  { %259 = vmatpush3.bf16.msra.mxu0 %v258_v7 }
  0x1b   :  { %265 = vmatpush3.bf16.msra.mxu1 %v264_v14 }
  0x1c   :  { %241 = vmatmul.mubr.msk.f32.vlgmr.msra.gmra.mrb[0].mxu0 %vm44_vm1, %v32_v8 }
  0xef   :  { %v114_v16 = vpop.f32.mrb[0].mxu0 }
  0xf0   :  { %v115_v17 = vadd.f32 %v217_v15, %v114_v16  ;;  %v242_v18 = vpop.f32.mrb[1].mxu0 }
  0xf2   :  { %v118_v19 = vmul.f32 0.2, %v115_v17 }
  0xf4   :  { %v119_v20 = vmax.f32 %v115_v17, %v118_v19 }
  0xf6   :  { %252 = vmatmul.mubr.msk.f32.vlgmr.msra.gmra.mrb[0].mxu1 %vm44_vm1, %v119_v20 }
 0x1c9   :  { %v200_v22 = vpop.f32.mrb[0].mxu1 }
 0x1ca   :  { %v201_v23 = vadd.f32 %v219_v21, %v200_v22  ;;  %v253_v24 = vpop.f32.mrb[1].mxu1 }
 0x1cc   :  { %v221_v25 = vmul.f32 -1.442695, %v201_v23 }
 0x1ce   :  { %270 = vpow2.f32 %v221_v25 }
 0x1d8   :  { %v271_v26 = vpop.eup %270 }
 0x1d9   :  { %v207_v27 = vadd.f32 1.0, %v271_v26 }
 0x1db   :  { %272 = vrcp.f32 %v207_v27 }
 0x1e5   :  { %v273_v28 = vpop.eup %272 }
 0x1e6   :  { %211 = vst.msk [vmem:[%s384_s5] sm:$0xff] %vm210_vm2, %v273_v28 }
 0x1e7   :  { %216 = vsyncpa [#allocation3], 1 }

</bundles_post_ra>
